<compile_context>
chip_gen: v7x
topology: tpu7x:2x2x1
jax: 0.10.0
libtpu: 0.0.40
codegen_flags: <defaults>
</compile_context>

<pallas_src>
import jax
import jax.numpy as jnp
from jax import lax
from jax.experimental import pallas as pl
from jax.experimental.pallas import tpu as pltpu

_EPS_GN = 1e-5
_EPS_LN = 1e-5


def _round_up(x, m):
    return (x + m - 1) // m * m


def _invariant_kwargs(single_buffer):
    """pipeline_mode kwargs for grid-invariant operands (constant index_map).

    Buffered(1) disables double-buffering for weights that are never re-fetched
    across grid steps, halving their resident VMEM (matters on v7x's 64 MiB).
    Falls back to default double-buffering if this Pallas build rejects it.
    """
    if not single_buffer or not hasattr(pl, "Buffered"):
        return {}
    try:
        pl.BlockSpec((8, 128), lambda i, j: (0, 0), pipeline_mode=pl.Buffered(1))
        return {"pipeline_mode": pl.Buffered(1)}
    except Exception:
        return {}


# ---------------- pass 1: GroupNorm partial statistics ----------------
def _make_stats_kernel():
    def kernel(z_ref, wbd_ref, out_ref):
        z = z_ref[0]                                                  # (TS, d_model) bf16
        # grouped 1x1 conv == one matmul with a block-diagonal weight (MXU, bf16 in / f32 acc)
        conv = jnp.dot(z, wbd_ref[...],
                       preferred_element_type=jnp.float32)            # (TS, d_codex) f32
        # fused single-pass stats: sum and sum-of-squares per channel
        s1 = jnp.sum(conv, axis=0, keepdims=True)                      # (1, d_codex)
        s2 = jnp.sum(conv * conv, axis=0, keepdims=True)               # (1, d_codex)
        out_ref[...] = jnp.concatenate([s1, s2], axis=0)[None, None]   # (1, 1, 2, d_codex)
    return kernel


# ---------------- pass 2: quantize + LayerNorm + post_proj ----------------
def _make_main_kernel(ts, d_codex, n_groups, codex_size):
    G, C = n_groups, codex_size

    def kernel(z_ref, wbd_ref, gna_ref, gnb_ref, cbdt_ref, c2_ref, cbd_ref,
               lnw_ref, lnb_ref, wpt_ref, bp_ref,
               zout_ref, idx_ref, err_ref):
        z = z_ref[0]                                                   # (TS, d_model) bf16
        conv = jnp.dot(z, wbd_ref[...],
                       preferred_element_type=jnp.float32)             # (TS, d_codex) f32

        # GroupNorm with per-(sample, group) stats from pass 1, already folded
        # with the affine params into per-channel scale / shift.
        ze = conv * gna_ref[0] + gnb_ref[0]                             # (TS, d_codex)

        # codebook distances: |c|^2 - 2 z.c  (the |z|^2 term is constant within a
        # group and cannot change the per-group argmin).  Cross term kept in f32.
        cross = jnp.dot(ze, cbdt_ref[...],
                        preferred_element_type=jnp.float32)             # (TS, G*C)
        score = c2_ref[...] - 2.0 * cross                               # (TS, G*C)

        # per-group argmin (first minimal index, like torch.argmin) + one-hot
        s3 = score.reshape(ts, G, C)
        min_s = jnp.min(s3, axis=-1, keepdims=True)
        iota = lax.broadcasted_iota(jnp.int32, (ts, G, C), 2)
        idx = jnp.min(jnp.where(s3 == min_s, iota, C), axis=-1)         # (TS, G) int32
        onehot = (iota == idx[:, :, None]).astype(jnp.bfloat16)         # (TS, G, C)

        # codeword lookup: one block-diagonal matmul (bf16 operands, f32 acc)
        zq = jnp.dot(onehot.reshape(ts, G * C), cbd_ref[...],
                     preferred_element_type=jnp.float32)                # (TS, d_codex)

        # commitment / codebook squared error, summed over d_codex per row
        diff = ze - zq
        err_ref[0] = jnp.sum(diff * diff, axis=-1, keepdims=True)       # (TS, 1)

        # straight-through estimator: forward value of Z_q is unchanged.
        # LayerNorm over d_codex (eps = 1e-5)
        mu = jnp.mean(zq, axis=-1, keepdims=True)
        var = jnp.mean(jnp.square(zq - mu), axis=-1, keepdims=True)
        ln = (zq - mu) * lax.rsqrt(var + _EPS_LN) * lnw_ref[...] + lnb_ref[...]

        # post_proj Linear: d_codex -> d_model (bf16 MXU, f32 acc, + bias)
        out = jnp.dot(ln.astype(jnp.bfloat16), wpt_ref[...],
                      preferred_element_type=jnp.float32) + bp_ref[...]
        zout_ref[0] = out.astype(zout_ref.dtype)
        idx_ref[0] = idx

    return kernel


def _forward_impl(Z, params, n_groups, codex_size, beta, single_buffer_weights):
    B, S, d_model = Z.shape
    codex = params["codex"].astype(jnp.float32)        # (G, C, dg)
    G, C, dg = codex.shape
    assert G == n_groups and C == codex_size
    d_codex = G * dg
    assert d_model % G == 0

    # ---- sequence tiling / optional lane padding of the output features ----
    ts = min(512, _round_up(S, 8))
    s_pad = _round_up(S, ts)
    s_tiles = s_pad // ts
    # pad post_proj output features to a multiple of 128 (unmasked full-lane
    # stores) only when d_model is already >= 128, to avoid inflating writes
    # for small models.
    d_model_out = _round_up(d_model, 128) if d_model >= 128 else d_model

    # ---- parameter preprocessing (trace-time glue, parameters only) ----
    conv_w = params["conv_w"].astype(jnp.float32)      # (d_codex, d_model // G)
    w_bd = jax.scipy.linalg.block_diag(
        *[conv_w[g * dg:(g + 1) * dg, :].T for g in range(G)]).astype(jnp.bfloat16)

    cbd = jax.scipy.linalg.block_diag(*[codex[g] for g in range(G)])   # (G*C, d_codex)
    cbd_t = cbd.T.astype(jnp.float32)                   # f32 distance path
    cbd_bf = cbd.astype(jnp.bfloat16)                   # bf16 lookup path
    c2 = jnp.sum(codex * codex, axis=-1).reshape(1, G * C).astype(jnp.float32)

    gn_w = params["gn_w"].astype(jnp.float32)
    gn_b = params["gn_b"].astype(jnp.float32)
    ln_w = params["ln_w"].reshape(1, d_codex).astype(jnp.float32)
    ln_b = params["ln_b"].reshape(1, d_codex).astype(jnp.float32)
    wp_t = params["post_w"].T.astype(jnp.bfloat16)      # (d_codex, d_model)
    bp = params["post_b"].reshape(1, d_model).astype(jnp.float32)
    if d_model_out != d_model:
        wp_t = jnp.pad(wp_t, ((0, 0), (0, d_model_out - d_model)))
        bp = jnp.pad(bp, ((0, 0), (0, d_model_out - d_model)))

    # bf16 activations, zero-padded along S (padded rows contribute 0 to the GN
    # sums; their outputs are sliced away below).
    z_bf = jnp.pad(Z, ((0, 0), (0, s_pad - S), (0, 0))).astype(jnp.bfloat16)

    inv_kw = _invariant_kwargs(single_buffer_weights)
    cparams = pltpu.CompilerParams(
        dimension_semantics=("parallel", "parallel"),
        vmem_limit_bytes=32 * 1024 * 1024)

    # ---------------- pass 1 ----------------
    stats = pl.pallas_call(
        _make_stats_kernel(),
        out_shape=jax.ShapeDtypeStruct((B, s_tiles, 2, d_codex), jnp.float32),
        grid_spec=pltpu.PrefetchScalarGridSpec(
            num_scalar_prefetch=0,
            grid=(B, s_tiles),
            in_specs=[
                pl.BlockSpec((1, ts, d_model), lambda b, s: (b, s, 0)),
                pl.BlockSpec((d_model, d_codex), lambda b, s: (0, 0), **inv_kw),
            ],
            out_specs=pl.BlockSpec((1, 1, 2, d_codex), lambda b, s: (b, s, 0, 0)),
        ),
        compiler_params=cparams,
    )(z_bf, w_bd)

    # fold stats + GroupNorm affine into per-(sample, channel) scale / shift
    ch_sum = jnp.sum(stats[:, :, 0, :], axis=1)         # (B, d_codex)
    ch_sq = jnp.sum(stats[:, :, 1, :], axis=1)          # (B, d_codex)
    cnt = jnp.float32(S * dg)                           # true element count per group
    grp_mean = jnp.sum(ch_sum.reshape(B, G, dg), axis=-1) / cnt
    grp_sq = jnp.sum(ch_sq.reshape(B, G, dg), axis=-1) / cnt
    grp_var = jnp.maximum(grp_sq - grp_mean * grp_mean, 0.0)
    grp_inv = lax.rsqrt(grp_var + _EPS_GN)              # (B, G)
    mean_c = jnp.repeat(grp_mean, dg, axis=-1)          # (B, d_codex)
    inv_c = jnp.repeat(grp_inv, dg, axis=-1)            # (B, d_codex)
    gn_scale = (inv_c * gn_w[None, :]).reshape(B, 1, d_codex)
    gn_shift = (gn_b[None, :] - mean_c * inv_c * gn_w[None, :]).reshape(B, 1, d_codex)

    # ---------------- pass 2 ----------------
    zout, idx, err = pl.pallas_call(
        _make_main_kernel(ts, d_codex, G, C),
        out_shape=(
            jax.ShapeDtypeStruct((B, s_pad, d_model_out), Z.dtype),
            jax.ShapeDtypeStruct((B, s_pad, G), jnp.int32),
            jax.ShapeDtypeStruct((B, s_pad, 1), jnp.float32),
        ),
        grid_spec=pltpu.PrefetchScalarGridSpec(
            num_scalar_prefetch=0,
            grid=(B, s_tiles),
            in_specs=[
                pl.BlockSpec((1, ts, d_model), lambda b, s: (b, s, 0)),          # Z tile
                pl.BlockSpec((d_model, d_codex), lambda b, s: (0, 0), **inv_kw),  # conv (block-diag)
                pl.BlockSpec((1, 1, d_codex), lambda b, s: (b, 0, 0)),            # GN scale (per b)
                pl.BlockSpec((1, 1, d_codex), lambda b, s: (b, 0, 0)),            # GN shift (per b)
                pl.BlockSpec((d_codex, G * C), lambda b, s: (0, 0), **inv_kw),    # codebook^T (f32)
                pl.BlockSpec((1, G * C), lambda b, s: (0, 0), **inv_kw),          # |c|^2
                pl.BlockSpec((G * C, d_codex), lambda b, s: (0, 0), **inv_kw),    # codebook (bf16)
                pl.BlockSpec((1, d_codex), lambda b, s: (0, 0), **inv_kw),        # LN gamma
                pl.BlockSpec((1, d_codex), lambda b, s: (0, 0), **inv_kw),        # LN beta
                pl.BlockSpec((d_codex, d_model_out), lambda b, s: (0, 0), **inv_kw),  # post W^T
                pl.BlockSpec((1, d_model_out), lambda b, s: (0, 0), **inv_kw),    # post bias
            ],
            out_specs=[
                pl.BlockSpec((1, ts, d_model_out), lambda b, s: (b, s, 0)),       # Z_q
                pl.BlockSpec((1, ts, G), lambda b, s: (b, s, 0)),                 # code indices
                pl.BlockSpec((1, ts, 1), lambda b, s: (b, s, 0)),                 # per-row sq. error
            ],
        ),
        compiler_params=cparams,
    )(z_bf, w_bd, gn_scale, gn_shift, cbd_t, c2, cbd_bf, ln_w, ln_b, wp_t, bp)

    z_q = zout[:, :S, :d_model]
    codex_idx = idx[:, :S, :]
    sse = jnp.sum(err[:, :S, 0])

    # loss = beta * mean((Z_e - sg(Z_q))^2) + mean((Z_q - sg(Z_e))^2);
    # both terms have identical forward value.
    mse = sse / jnp.float32(B * S * d_codex)
    loss = (beta + 1.0) * mse

    # dense one-hot reconstructed outside the kernel only for interface parity;
    # consumers that just need counts should use codex_idx directly.
    codex_probs = jax.nn.one_hot(codex_idx, C, dtype=jnp.float32)       # (B, S, G, C)

    # TODO(synk): EMA codex_counts update (update_counts + all_reduce) and the
    # unused perplexity value are training-time state / side effects, not
    # returned values; intentionally omitted (as is the custom backward).
    return z_q, loss, codex_probs


def kmeans_vq_forward(Z, params, *, n_groups, codex_size, beta=0.25):
    """Forward pass of KmeansVectorQuantizer. Returns (Z_q, loss, codex_probs)."""
    try:
        return _forward_impl(Z, params, n_groups, codex_size, beta, True)
    except Exception:
        # retry with default double-buffering if single-buffered invariant
        # weights are rejected by this Pallas build
        return _forward_impl(Z, params, n_groups, codex_size, beta, False)


if __name__ == "__main__":
    B, S = 2, 8
    d_model, d_codex, n_groups, codex_size = 32, 16, 4, 8
    dg = d_codex // n_groups
    dm_g = d_model // n_groups

    key = jax.random.PRNGKey(0)
    k_z, k_conv, k_codex, k_post = jax.random.split(key, 4)

    Z = jax.random.normal(k_z, (B, S, d_model), jnp.float32)
    params = {
        "conv_w": jax.random.normal(k_conv, (d_codex, dm_g), jnp.float32) * 0.1,
        "gn_w": jnp.ones((d_codex,), jnp.float32),
        "gn_b": jnp.zeros((d_codex,), jnp.float32),
        "codex": jax.random.normal(k_codex, (n_groups, codex_size, dg), jnp.float32),
        "ln_w": jnp.ones((d_codex,), jnp.float32),
        "ln_b": jnp.zeros((d_codex,), jnp.float32),
        "post_w": jax.random.normal(k_post, (d_model, d_codex), jnp.float32) * 0.02,
        "post_b": jnp.zeros((d_model,), jnp.float32),
    }

    Z_q, loss, codex_probs = kmeans_vq_forward(
        Z, params, n_groups=n_groups, codex_size=codex_size, beta=0.25)
    jax.block_until_ready((Z_q, loss, codex_probs))

    assert Z_q.shape == (B, S, d_model)
    assert codex_probs.shape == (B, S, n_groups, codex_size)
    assert loss.shape == ()
    assert bool(jnp.isfinite(loss))
    assert bool(jnp.all(jnp.isfinite(Z_q)))
    # each (sample, position, group) selects exactly one codeword
    assert bool(jnp.all(jnp.sum(codex_probs, axis=-1) == 1.0))
    print("KERNEL_OK")
</pallas_src>

<mosaic_0001>
module attributes {stable_mosaic.version = 11 : i64} {
  func.func @kernel(%arg0: i32, %arg1: i32, %arg2: memref<1x8x32xbf16, #tpu.memory_space<vmem>>, %arg3: memref<32x16xbf16, #tpu.memory_space<vmem>>, %arg4: memref<1x1x2x16xf32, #tpu.memory_space<vmem>>) attributes {dimension_semantics = [#tpu.dimension_semantics<parallel>, #tpu.dimension_semantics<parallel>], iteration_bounds = array<i64: 2, 1>, scalar_prefetch = 0 : i64, scratch_operands = 0 : i64, tpu.core_type = #tpu.core_type<tc>, window_params = [{transform_indices = @transform_0, window_bounds = array<i64: 1, 8, 32>}, {pipeline_mode = #tpu.pipeline_mode<synchronous>, transform_indices = @transform_1, window_bounds = array<i64: 32, 16>}, {transform_indices = @transform_2, window_bounds = array<i64: 1, 1, 2, 16>}]} {
    %c0 = arith.constant 0 : index
    %c0_0 = arith.constant 0 : index
    %c0_1 = arith.constant 0 : index
    %0 = vector.load %arg2[%c0, %c0_0, %c0_1] : memref<1x8x32xbf16, #tpu.memory_space<vmem>>, vector<1x8x32xbf16>
    %1 = vector.shape_cast %0 : vector<1x8x32xbf16> to vector<8x32xbf16>
    %c0_2 = arith.constant 0 : index
    %c0_3 = arith.constant 0 : index
    %2 = vector.load %arg3[%c0_2, %c0_3] : memref<32x16xbf16, #tpu.memory_space<vmem>>, vector<32x16xbf16>
    %cst = arith.constant dense<0.000000e+00> : vector<8x16xf32>
    %3 = tpu.matmul %1, %2, %cst {dimension_numbers = #tpu.dot_dimension_numbers<[1], [0], [0], [1], [0, 0, 1, 1], [], []>} : vector<8x32xbf16>, vector<32x16xbf16>, vector<8x16xf32> -> vector<8x16xf32>
    %cst_4 = arith.constant dense<0.000000e+00> : vector<16xf32>
    %4 = vector.multi_reduction <add>, %3, %cst_4 [0] : vector<8x16xf32> to vector<16xf32>
    %5 = vector.shape_cast %4 : vector<16xf32> to vector<1x16xf32>
    %6 = arith.mulf %3, %3 : vector<8x16xf32>
    %cst_5 = arith.constant dense<0.000000e+00> : vector<16xf32>
    %7 = vector.multi_reduction <add>, %6, %cst_5 [0] : vector<8x16xf32> to vector<16xf32>
    %8 = vector.shape_cast %7 : vector<16xf32> to vector<1x16xf32>
    %9 = tpu.concatenate %5, %8 in 0 : vector<1x16xf32>, vector<1x16xf32> -> vector<2x16xf32>
    %10 = vector.shape_cast %9 : vector<2x16xf32> to vector<1x1x2x16xf32>
    %c0_6 = arith.constant 0 : index
    %c0_7 = arith.constant 0 : index
    %c0_8 = arith.constant 0 : index
    %c0_9 = arith.constant 0 : index
    %11 = vector.load %arg4[%c0_6, %c0_7, %c0_8, %c0_9] : memref<1x1x2x16xf32, #tpu.memory_space<vmem>>, vector<1x1x2x16xf32>
    tpu.vector_store %arg4[%c0_6, %c0_7, %c0_8, %c0_9], %10 {strides = array<i32>} : memref<1x1x2x16xf32, #tpu.memory_space<vmem>>, vector<1x1x2x16xf32>,
    return
  }
  func.func @transform_0(%arg0: i32, %arg1: i32) -> (i32, i32, i32) {
    %c0_i32 = arith.constant 0 : i32
    %c0_i32_0 = arith.constant 0 : i32
    return %arg0, %arg1, %c0_i32 : i32, i32, i32
  }
  func.func @transform_1(%arg0: i32, %arg1: i32) -> (i32, i32) {
    %c0_i32 = arith.constant 0 : i32
    %c0_i32_0 = arith.constant 0 : i32
    %c0_i32_1 = arith.constant 0 : i32
    return %c0_i32, %c0_i32_0 : i32, i32
  }
  func.func @transform_2(%arg0: i32, %arg1: i32) -> (i32, i32, i32, i32) {
    %c0_i32 = arith.constant 0 : i32
    %c0_i32_0 = arith.constant 0 : i32
    %c0_i32_1 = arith.constant 0 : i32
    return %arg0, %arg1, %c0_i32, %c0_i32_0 : i32, i32, i32, i32
  }
}

module attributes {stable_mosaic.version = 11 : i64} {
  func.func @kernel(%arg0: i32, %arg1: i32, %arg2: memref<1x8x32xbf16, #tpu.memory_space<vmem>>, %arg3: memref<32x16xbf16, #tpu.memory_space<vmem>>, %arg4: memref<1x1x2x16xf32, #tpu.memory_space<vmem>>) attributes {dimension_semantics = [#tpu.dimension_semantics<parallel>, #tpu.dimension_semantics<parallel>], iteration_bounds = array<i64: 2, 1>, scalar_prefetch = 0 : i64, scratch_operands = 0 : i64, tpu.core_type = #tpu.core_type<tc>, window_params = [{transform_indices = @transform_0, window_bounds = array<i64: 1, 8, 32>}, {pipeline_mode = #tpu.pipeline_mode<synchronous>, transform_indices = @transform_1, window_bounds = array<i64: 32, 16>}, {transform_indices = @transform_2, window_bounds = array<i64: 1, 1, 2, 16>}]} {
    %c0 = arith.constant 0 : index
    %c0_0 = arith.constant 0 : index
    %c0_1 = arith.constant 0 : index
    %0 = vector.load %arg2[%c0, %c0_0, %c0_1] : memref<1x8x32xbf16, #tpu.memory_space<vmem>>, vector<1x8x32xbf16>
    %1 = vector.shape_cast %0 : vector<1x8x32xbf16> to vector<8x32xbf16>
    %c0_2 = arith.constant 0 : index
    %c0_3 = arith.constant 0 : index
    %2 = vector.load %arg3[%c0_2, %c0_3] : memref<32x16xbf16, #tpu.memory_space<vmem>>, vector<32x16xbf16>
    %cst = arith.constant dense<0.000000e+00> : vector<8x16xf32>
    %3 = tpu.matmul %1, %2, %cst {dimension_numbers = #tpu.dot_dimension_numbers<[1], [0], [0], [1], [0, 0, 1, 1], [], []>} : vector<8x32xbf16>, vector<32x16xbf16>, vector<8x16xf32> -> vector<8x16xf32>
    %cst_4 = arith.constant dense<0.000000e+00> : vector<16xf32>
    %4 = vector.multi_reduction <add>, %3, %cst_4 [0] : vector<8x16xf32> to vector<16xf32>
    %5 = vector.shape_cast %4 : vector<16xf32> to vector<1x16xf32>
    %6 = arith.mulf %3, %3 : vector<8x16xf32>
    %cst_5 = arith.constant dense<0.000000e+00> : vector<16xf32>
    %7 = vector.multi_reduction <add>, %6, %cst_5 [0] : vector<8x16xf32> to vector<16xf32>
    %8 = vector.shape_cast %7 : vector<16xf32> to vector<1x16xf32>
    %9 = tpu.concatenate %5, %8 in 0 : vector<1x16xf32>, vector<1x16xf32> -> vector<2x16xf32>
    %10 = vector.shape_cast %9 : vector<2x16xf32> to vector<1x1x2x16xf32>
    %c0_6 = arith.constant 0 : index
    %c0_7 = arith.constant 0 : index
    %c0_8 = arith.constant 0 : index
    %c0_9 = arith.constant 0 : index
    %11 = vector.load %arg4[%c0_6, %c0_7, %c0_8, %c0_9] : memref<1x1x2x16xf32, #tpu.memory_space<vmem>>, vector<1x1x2x16xf32>
    tpu.vector_store %arg4[%c0_6, %c0_7, %c0_8, %c0_9], %10 {strides = array<i32>} : memref<1x1x2x16xf32, #tpu.memory_space<vmem>>, vector<1x1x2x16xf32>,
    return
  }
  func.func @transform_0(%arg0: i32, %arg1: i32) -> (i32, i32, i32) {
    %c0_i32 = arith.constant 0 : i32
    %c0_i32_0 = arith.constant 0 : i32
    return %arg0, %arg1, %c0_i32 : i32, i32, i32
  }
  func.func @transform_1(%arg0: i32, %arg1: i32) -> (i32, i32) {
    %c0_i32 = arith.constant 0 : i32
    %c0_i32_0 = arith.constant 0 : i32
    %c0_i32_1 = arith.constant 0 : i32
    return %c0_i32, %c0_i32_0 : i32, i32
  }
  func.func @transform_2(%arg0: i32, %arg1: i32) -> (i32, i32, i32, i32) {
    %c0_i32 = arith.constant 0 : i32
    %c0_i32_0 = arith.constant 0 : i32
    %c0_i32_1 = arith.constant 0 : i32
    return %arg0, %arg1, %c0_i32, %c0_i32_0 : i32, i32, i32, i32
  }
}

</mosaic_0001>

<bundles_post_ra>
// kernel: tpu_custom_call.1
= control target key start
LH: loop header
LB: loop body
LE: loop exit
PB: predicated region body
PF: predicated region fallthrough
CT: control target
= control target key end

     0   :  { %7 = vsyncpa [#allocation3], 0  ;;  %s632_s0 = inlined_call_operand.vmem [shape: bf16[2,8,32], index: 0, kind: input, shape index: {}]   ;;  %s633_s1 = inlined_call_operand.vmem [shape: bf16[32,16], index: 1, kind: input, shape index: {}]   ;;  %s634_s2 = inlined_call_operand.hbm [shape: f32[2,1,2,16], index: 2, kind: output, shape index: {}]  }
   0x1   :  { %9 = vsyncpa [#allocation3 + $0x1], 0  ;;  %s514_s9 = smov 0   ;;  %s516_s10 = smov 0  }
   0x2   :  { %s518_s11 = smov 0   ;;  %s520_s12 = smov 0  }
   0x3   :  { %s522_s13 = smov 0   ;;  %s524_s14 = smov 0  }
   0x4 LB: > { %s332_s15 = sadd.s32 4294967295, %s494_s14   ;;  %s333_s16 = sadd.s32 4294967294, %s494_s14   ;;  %s494_s14 = sphi %s524_s14, %s15_s14   ;;  %s490_s13 = sphi %s522_s13, %s641_s13   ;;  %s486_s12 = sphi %s520_s12, %s640_s12   ;;  %s482_s11 = sphi %s518_s11, %s639_s11   ;;  %s478_s10 = sphi %s516_s10, %s638_s10   ;;  %s474_s9 = sphi %s514_s9, %s637_s9  }
   0x5   : > { %s27_s17 = sadd.s32 1, %s490_s13  ;;  %s85_s18 = sadd.s32 1, %s482_s11 }
   0x6   : > { %p29_p0 = scmp.ge.s32.totalorder %s27_s17, 2  ;;  %p95_p1 = scmp.ne.s32.totalorder %s482_s11, %s478_s10 }
   0x7   : > { %p96_p2 = scmp.eq.s32.totalorder %s332_s15, 1  ;;  %p101_p3 = scmp.ne.s32.totalorder %s478_s10, %s474_s9 }
   0x8   : > { %s643_s17 = smov (%p29_p0, %s27_s17), 0  ;;  %p102_p5 = scmp.eq.s32.totalorder %s333_s16, 1 }
   0x9   : > { %p554_p4 = por %p96_p2, %p95_p1  ;;  %s80_s20 = ssub.s32 %s490_s13, %s643_s17 }
   0xa   : > { %p336_p6 = scmp.ge.s32.totalorder %s494_s14, 1  ;;  %p83_p7 = scmp.eq.s32.totalorder %s80_s20, 0 }
   0xb   : > { %p561_p8 = por %p102_p5, %p101_p3  ;;  %p133_p9 = scmp.lt.s32.totalorder %s494_s14, 3 }
   0xc   : > { %s567_s22 = scalar_select %p83_p7, %s482_s11, %s85_s18  }
   0xd   : > { %p134_p10 = pnand %p336_p6, %p133_p9 }
   0xe   : > { %v414_v0 = vld [vmem:[%s633_s1] sm:$0xff] (!%p134_p10)   ;;  %v496_v1 = vmov (!%p134_p10), 0.0   ;;  %v415_v2 = vld [vmem:[%s633_s1 + $0x8] sm:$0xff] (!%p134_p10)   ;;  %vm497_vm0 = vmmov (!%p134_p10), 0   ;;  %p157_p11 = scmp.lt.s32.totalorder (!%p134_p10), %s486_s12, 1  ;;  %vm182_vm1 = vcmask (!%p134_p10), 261120  }
   0xf   : > { %137 = sbr.rel (%p134_p10) target bundleno = 269 (0x10d), region = 28  ;;  %349 = vmatprep.subr.bf16.mxu0 (!%p134_p10), %v496_v1  ;;  %353 = vmatprep.mubr.msk.bf16.mxu0 (!%p134_p10), %vm497_vm0, %v496_v1  ;;  %vm226_vm2 = vcmask (!%p134_p10), 130048   ;;  %s154_s4 = sand.u32 (!%p134_p10), 1, %s478_s10   ;;  %vm242_vm3 = vcmask (!%p134_p10), 1040384   ;;  %vm244_vm4 = vcmask (!%p134_p10), 123904  }
  0x10   : > { %350 = vmatpush3.bf16.msra.mxu0 (!%p134_p10), %v414_v0  ;;  %s337_s5 = sshll.u32 (!%p134_p10), %s154_s4, 1  ;;  %s343_s6 = sshll.u32 (!%p134_p10), %s486_s12, 5 }
  0x11   : > { %351 = vmatprep.subr.bf16.mxu0 (!%p134_p10), %v496_v1  ;;  %s156_s7 = scalar_lea.vmem (!%p134_p10), [#allocation2], %s337_s5  ;;  %s585_s18 = scalar_lea.hbm (!%p134_p10), %s634_s2, %s343_s6 }
  0x12   : > { %s261_s8 = sshll.u32 (!%p134_p10), %s156_s7, 4  ;;  %s247_s20 = scalar_lea.sflag (!%p134_p10), [#allocation3], %s154_s4  ;;  %s587_s8 = int_to_ptr.vmem [resolvable:$true] %s261_s8 }
  0x13   : > { %s498_s23 = smov (!%p134_p10), [#allocation2]  }
  0x14   : > { %352 = vmatpush3.bf16.msra.mxu0 (!%p134_p10), %v415_v2  ;;  %s420_s24 = sshll.u32 (!%p134_p10), %s498_s23, 4  ;;  %s421_s24 = int_to_ptr.vmem [resolvable:$false] %s420_s24 }
  0x15   : > { %s422_s25 = scalar_lea.vmem (!%p134_p10), %s421_s24, 64  ;;  %p423_p1 = scmp.lt.s32.totalorder (!%p134_p10), %s587_s8, %s421_s24 }
  0x16   : > { %s158_s27 = scalar_select %p157_p11, %s486_s12, 1 }
  0x17   : > { %s416_s12 = scalar_lea.vmem %s587_s8, 32 }
  0x18   : > { %s338_s28 = sshll.u32 %s158_s27, 2  ;;  %p417_p12 = scmp.ne.s32.totalorder %s587_s8, %s416_s12 }
  0x19   : > { %s163_s3 = scalar_lea.vmem %s632_s0, %s338_s28  ;;  %p424_p2 = scmp.lt.s32.totalorder %s422_s25, %s416_s12 }
  0x1a   : > { %v165_v3 = vld [vmem:[%s163_s3] sm:$0xf]  ;;  %p418_p13 = pnand %p417_p12, %p554_p4 }
  0x1b   : > { %354 = vmatmul.mubr.msk.bf16.vlgmr.msra.gmra.mrb[0].mxu0 %vm182_vm1, %v165_v3  ;;  %p425_p3 = por %p424_p2, %p423_p1 }
  0x1c   : > { %p419_p0 = pneg %p418_p13 }
  0x1e   : > { %p426_p5 = pnand %p425_p3, %p419_p0 }
  0xee   : > { %v220_v4 = vpop.f32.mrb[0].mxu0 }
  0xef   : > { %v227_v5 = vsel %vm226_vm2, %v220_v4, 0.0  ;;  %v234_v6 = vmul.f32 %v220_v4, %v220_v4  ;;  %v355_v7 = vpop.f32.mrb[1].mxu0 }
  0xf0   : > { %v228_v8 = vrot.slane %v227_v5, 4  ;;  %v223_v9 = vpop.f32.mrb[2].mxu0 }
  0xf1   : > { %v235_v10 = vsel %vm226_vm2, %v234_v6, 0.0  ;;  %v356_v11 = vpop.f32.mrb[3].mxu0 }
  0xf2   : > { %v229_v12 = vadd.f32 %v228_v8, %v227_v5  ;;  %v236_v13 = vrot.slane %v235_v10, 4 }
  0xf4   : > { %v230_v14 = vrot.slane %v229_v12, 2  ;;  %v237_v15 = vadd.f32 %v236_v13, %v235_v10 }
  0xf6   : > { %v231_v16 = vadd.f32 %v230_v14, %v229_v12  ;;  %v238_v17 = vrot.slane %v237_v15, 2 }
  0xf8   : > { %v232_v18 = vrot.slane %v231_v16, 1  ;;  %v239_v19 = vadd.f32 %v238_v17, %v237_v15 }
  0xfa   : > { %v240_v20 = vrot.slane %v239_v19, 1  ;;  %v233_v21 = vadd.f32 %v232_v18, %v231_v16 }
  0xfc   : > { %v241_v22 = vadd.f32 %v240_v20, %v239_v19 }
  0xfe   : > { %v243_v23 = vsel %vm242_vm3, %v233_v21, %v241_v22 }
  0xff   : > { %245 = vst.msk [vmem:[%s156_s7] sm:$0x3] %vm244_vm4, %v243_v23 }
 0x100   : > { %429 = shalt.err (!%p426_p5)
}
 0x101   : > { %s430_s26 = scalar_lea.hbm %s585_s18, 32  ;;  %s434_s29 = scalar_lea.hbm %s634_s2, 64 }
 0x102   : > { %p431_p6 = scmp.ne.s32.totalorder %s585_s18, %s430_s26  ;;  %p435_p10 = scmp.lt.u32.totalorder %s585_s18, %s634_s2 }
 0x103   : > { %p436_p11 = scmp.lt.u32.totalorder %s434_s29, %s430_s26  ;;  %p438_p13 = scmp.lt.u32.totalorder %s430_s26, %s585_s18 }
 0x104   : > { %p432_p7 = pnand %p431_p6, %p554_p4 }
 0x105   : > { %p437_p12 = por %p436_p11, %p435_p10 }
 0x106   : > { %p433_p9 = pneg %p432_p7 }
 0x107   : > { %p439_p0 = por %p438_p13, %p437_p12 }
 0x109   : > { %p440_p1 = pnand %p439_p0, %p433_p9 }
 0x10b   : > { %443 = shalt.err (!%p440_p1)
}
 0x10c   : > { %357 = dma.vmem_to_hbm [thread:$0]  (%p554_p4), %s587_s8, 32, %s585_s18, %s247_s20  }
 0x10d PF: > { %p363_p2 = scmp.ge.s32.totalorder %s494_s14, 2  ;;  %s273_s4 = sand.u32 1, %s474_s9  }
 0x10e   : > { %s274_s5 = scalar_lea.sflag [#allocation3], %s273_s4 }
 0x10f   : > { %p360_p3 = pnand %p363_p2, %p561_p8 }
 0x111   : > { %469 = dma.done.wait (!%p360_p3), %s274_s5, 32  }
 0x112   : > { %471 = vsyncadd (!%p360_p3), %s274_s5, 4294967264  ;;  %s15_s14 = sadd.s32 1, %s494_s14   ;;  %s637_s9 = smov %s478_s10 }
 0x113   : > { %p12_p5 = scmp.ge.s32.totalorder %s15_s14, 4   ;;  %s638_s10 = smov %s482_s11 }
 0x114   : > { %s639_s11 = smov %s567_s22  ;;  %s640_s12 = smov %s490_s13 }
 0x115   : > { %s641_s13 = smov %s643_s17  ;;  %14 = sbr.rel (!%p12_p5) target bundleno = 4 (0x4), region = 63 }
 0x11c   :  { %279 = vsyncpa [#allocation3], 1 }
 0x11d   :  { %281 = vsyncpa [#allocation3 + $0x1], 1 }

// kernel: tpu_custom_call.1
= control target key start
LH: loop header
LB: loop body
LE: loop exit
PB: predicated region body
PF: predicated region fallthrough
CT: control target
= control target key end

     0   :  { %7 = vsyncpa [#allocation3], 0  ;;  %s632_s0 = inlined_call_operand.vmem [shape: bf16[2,8,32], index: 0, kind: input, shape index: {}]   ;;  %s633_s1 = inlined_call_operand.vmem [shape: bf16[32,16], index: 1, kind: input, shape index: {}]   ;;  %s634_s2 = inlined_call_operand.hbm [shape: f32[2,1,2,16], index: 2, kind: output, shape index: {}]  }
   0x1   :  { %9 = vsyncpa [#allocation3 + $0x1], 0  ;;  %s514_s9 = smov 0   ;;  %s516_s10 = smov 0  }
   0x2   :  { %s518_s11 = smov 0   ;;  %s520_s12 = smov 0  }
   0x3   :  { %s522_s13 = smov 0   ;;  %s524_s14 = smov 0  }
   0x4 LB: > { %s332_s15 = sadd.s32 4294967295, %s494_s14   ;;  %s333_s16 = sadd.s32 4294967294, %s494_s14   ;;  %s494_s14 = sphi %s524_s14, %s15_s14   ;;  %s490_s13 = sphi %s522_s13, %s641_s13   ;;  %s486_s12 = sphi %s520_s12, %s640_s12   ;;  %s482_s11 = sphi %s518_s11, %s639_s11   ;;  %s478_s10 = sphi %s516_s10, %s638_s10   ;;  %s474_s9 = sphi %s514_s9, %s637_s9  }
   0x5   : > { %s27_s17 = sadd.s32 1, %s490_s13  ;;  %s85_s18 = sadd.s32 1, %s482_s11 }
   0x6   : > { %p29_p0 = scmp.ge.s32.totalorder %s27_s17, 2  ;;  %p95_p1 = scmp.ne.s32.totalorder %s482_s11, %s478_s10 }
   0x7   : > { %p96_p2 = scmp.eq.s32.totalorder %s332_s15, 1  ;;  %p101_p3 = scmp.ne.s32.totalorder %s478_s10, %s474_s9 }
   0x8   : > { %s643_s17 = smov (%p29_p0, %s27_s17), 0  ;;  %p102_p5 = scmp.eq.s32.totalorder %s333_s16, 1 }
   0x9   : > { %p554_p4 = por %p96_p2, %p95_p1  ;;  %s80_s20 = ssub.s32 %s490_s13, %s643_s17 }
   0xa   : > { %p336_p6 = scmp.ge.s32.totalorder %s494_s14, 1  ;;  %p83_p7 = scmp.eq.s32.totalorder %s80_s20, 0 }
   0xb   : > { %p561_p8 = por %p102_p5, %p101_p3  ;;  %p133_p9 = scmp.lt.s32.totalorder %s494_s14, 3 }
   0xc   : > { %s567_s22 = scalar_select %p83_p7, %s482_s11, %s85_s18  }
   0xd   : > { %p134_p10 = pnand %p336_p6, %p133_p9 }
   0xe   : > { %v414_v0 = vld [vmem:[%s633_s1] sm:$0xff] (!%p134_p10)   ;;  %v496_v1 = vmov (!%p134_p10), 0.0   ;;  %v415_v2 = vld [vmem:[%s633_s1 + $0x8] sm:$0xff] (!%p134_p10)   ;;  %vm497_vm0 = vmmov (!%p134_p10), 0   ;;  %p157_p11 = scmp.lt.s32.totalorder (!%p134_p10), %s486_s12, 1  ;;  %vm182_vm1 = vcmask (!%p134_p10), 261120  }
   0xf   : > { %137 = sbr.rel (%p134_p10) target bundleno = 269 (0x10d), region = 28  ;;  %349 = vmatprep.subr.bf16.mxu0 (!%p134_p10), %v496_v1  ;;  %353 = vmatprep.mubr.msk.bf16.mxu0 (!%p134_p10), %vm497_vm0, %v496_v1  ;;  %vm226_vm2 = vcmask (!%p134_p10), 130048   ;;  %s154_s4 = sand.u32 (!%p134_p10), 1, %s478_s10   ;;  %vm242_vm3 = vcmask (!%p134_p10), 1040384   ;;  %vm244_vm4 = vcmask (!%p134_p10), 123904  }
  0x10   : > { %350 = vmatpush3.bf16.msra.mxu0 (!%p134_p10), %v414_v0  ;;  %s337_s5 = sshll.u32 (!%p134_p10), %s154_s4, 1  ;;  %s343_s6 = sshll.u32 (!%p134_p10), %s486_s12, 5 }
  0x11   : > { %351 = vmatprep.subr.bf16.mxu0 (!%p134_p10), %v496_v1  ;;  %s156_s7 = scalar_lea.vmem (!%p134_p10), [#allocation2], %s337_s5  ;;  %s585_s18 = scalar_lea.hbm (!%p134_p10), %s634_s2, %s343_s6 }
  0x12   : > { %s261_s8 = sshll.u32 (!%p134_p10), %s156_s7, 4  ;;  %s247_s20 = scalar_lea.sflag (!%p134_p10), [#allocation3], %s154_s4  ;;  %s587_s8 = int_to_ptr.vmem [resolvable:$true] %s261_s8 }
  0x13   : > { %s498_s23 = smov (!%p134_p10), [#allocation2]  }
  0x14   : > { %352 = vmatpush3.bf16.msra.mxu0 (!%p134_p10), %v415_v2  ;;  %s420_s24 = sshll.u32 (!%p134_p10), %s498_s23, 4  ;;  %s421_s24 = int_to_ptr.vmem [resolvable:$false] %s420_s24 }
  0x15   : > { %s422_s25 = scalar_lea.vmem (!%p134_p10), %s421_s24, 64  ;;  %p423_p1 = scmp.lt.s32.totalorder (!%p134_p10), %s587_s8, %s421_s24 }
  0x16   : > { %s158_s27 = scalar_select %p157_p11, %s486_s12, 1 }
  0x17   : > { %s416_s12 = scalar_lea.vmem %s587_s8, 32 }
  0x18   : > { %s338_s28 = sshll.u32 %s158_s27, 2  ;;  %p417_p12 = scmp.ne.s32.totalorder %s587_s8, %s416_s12 }
  0x19   : > { %s163_s3 = scalar_lea.vmem %s632_s0, %s338_s28  ;;  %p424_p2 = scmp.lt.s32.totalorder %s422_s25, %s416_s12 }
  0x1a   : > { %v165_v3 = vld [vmem:[%s163_s3] sm:$0xf]  ;;  %p418_p13 = pnand %p417_p12, %p554_p4 }
  0x1b   : > { %354 = vmatmul.mubr.msk.bf16.vlgmr.msra.gmra.mrb[0].mxu0 %vm182_vm1, %v165_v3  ;;  %p425_p3 = por %p424_p2, %p423_p1 }
  0x1c   : > { %p419_p0 = pneg %p418_p13 }
  0x1e   : > { %p426_p5 = pnand %p425_p3, %p419_p0 }
  0xee   : > { %v220_v4 = vpop.f32.mrb[0].mxu0 }
  0xef   : > { %v227_v5 = vsel %vm226_vm2, %v220_v4, 0.0  ;;  %v234_v6 = vmul.f32 %v220_v4, %v220_v4  ;;  %v355_v7 = vpop.f32.mrb[1].mxu0 }
  0xf0   : > { %v228_v8 = vrot.slane %v227_v5, 4  ;;  %v223_v9 = vpop.f32.mrb[2].mxu0 }
  0xf1   : > { %v235_v10 = vsel %vm226_vm2, %v234_v6, 0.0  ;;  %v356_v11 = vpop.f32.mrb[3].mxu0 }
  0xf2   : > { %v229_v12 = vadd.f32 %v228_v8, %v227_v5  ;;  %v236_v13 = vrot.slane %v235_v10, 4 }
  0xf4   : > { %v230_v14 = vrot.slane %v229_v12, 2  ;;  %v237_v15 = vadd.f32 %v236_v13, %v235_v10 }
  0xf6   : > { %v231_v16 = vadd.f32 %v230_v14, %v229_v12  ;;  %v238_v17 = vrot.slane %v237_v15, 2 }
  0xf8   : > { %v232_v18 = vrot.slane %v231_v16, 1  ;;  %v239_v19 = vadd.f32 %v238_v17, %v237_v15 }
  0xfa   : > { %v240_v20 = vrot.slane %v239_v19, 1  ;;  %v233_v21 = vadd.f32 %v232_v18, %v231_v16 }
  0xfc   : > { %v241_v22 = vadd.f32 %v240_v20, %v239_v19 }
  0xfe   : > { %v243_v23 = vsel %vm242_vm3, %v233_v21, %v241_v22 }
  0xff   : > { %245 = vst.msk [vmem:[%s156_s7] sm:$0x3] %vm244_vm4, %v243_v23 }
 0x100   : > { %429 = shalt.err (!%p426_p5)
}
 0x101   : > { %s430_s26 = scalar_lea.hbm %s585_s18, 32  ;;  %s434_s29 = scalar_lea.hbm %s634_s2, 64 }
 0x102   : > { %p431_p6 = scmp.ne.s32.totalorder %s585_s18, %s430_s26  ;;  %p435_p10 = scmp.lt.u32.totalorder %s585_s18, %s634_s2 }
 0x103   : > { %p436_p11 = scmp.lt.u32.totalorder %s434_s29, %s430_s26  ;;  %p438_p13 = scmp.lt.u32.totalorder %s430_s26, %s585_s18 }
 0x104   : > { %p432_p7 = pnand %p431_p6, %p554_p4 }
 0x105   : > { %p437_p12 = por %p436_p11, %p435_p10 }
 0x106   : > { %p433_p9 = pneg %p432_p7 }
 0x107   : > { %p439_p0 = por %p438_p13, %p437_p12 }
 0x109   : > { %p440_p1 = pnand %p439_p0, %p433_p9 }
 0x10b   : > { %443 = shalt.err (!%p440_p1)
}
 0x10c   : > { %357 = dma.vmem_to_hbm [thread:$0]  (%p554_p4), %s587_s8, 32, %s585_s18, %s247_s20  }
 0x10d PF: > { %p363_p2 = scmp.ge.s32.totalorder %s494_s14, 2  ;;  %s273_s4 = sand.u32 1, %s474_s9  }
 0x10e   : > { %s274_s5 = scalar_lea.sflag [#allocation3], %s273_s4 }
 0x10f   : > { %p360_p3 = pnand %p363_p2, %p561_p8 }
 0x111   : > { %469 = dma.done.wait (!%p360_p3), %s274_s5, 32  }
 0x112   : > { %471 = vsyncadd (!%p360_p3), %s274_s5, 4294967264  ;;  %s15_s14 = sadd.s32 1, %s494_s14   ;;  %s637_s9 = smov %s478_s10 }
 0x113   : > { %p12_p5 = scmp.ge.s32.totalorder %s15_s14, 4   ;;  %s638_s10 = smov %s482_s11 }
 0x114   : > { %s639_s11 = smov %s567_s22  ;;  %s640_s12 = smov %s490_s13 }
 0x115   : > { %s641_s13 = smov %s643_s17  ;;  %14 = sbr.rel (!%p12_p5) target bundleno = 4 (0x4), region = 63 }
 0x11c   :  { %279 = vsyncpa [#allocation3], 1 }
 0x11d   :  { %281 = vsyncpa [#allocation3 + $0x1], 1 }

</bundles_post_ra>
